<compile_context>
chip_gen: v6e
topology: v6e:2x2x1
jax: 0.10.0
libtpu: 0.0.40
codegen_flags: <defaults>
</compile_context>

<pallas_src>
import jax
import jax.numpy as jnp
from jax.experimental import pallas as pl
from jax.experimental.pallas import tpu as pltpu


def _maxpool2x2_kernel(x_ref, o_ref):
    # x_ref block: (cb, th, W)  ->  o_ref block: (cb, th//2, W//2)
    cb, th, w = x_ref.shape
    th2, w2 = th // 2, w // 2

    # ---- H-pair max: strided ref loads along the sublane (H) axis --------
    top = x_ref[:, pl.ds(0, th2, stride=2), :]     # rows 0, 2, 4, ...
    bot = x_ref[:, pl.ds(1, th2, stride=2), :]     # rows 1, 3, 5, ...
    hmax = jnp.maximum(top, bot)                   # (cb, th2, w)

    # ---- W-pair max + lane compaction via one-hot matmuls on the MXU -----
    # Column pairs (2j, 2j+1) live on the lane axis; compacting them to lane
    # j is a cross-lane shuffle.  The MXU is completely idle in this
    # mem-bound kernel, so the shuffle is done as hmax @ S with one-hot
    # selection matrices (built from 2-D iotas, hoisted by the compiler).
    # NOTE: exact for all finite values at HIGHEST precision; +/-inf or NaN
    # inputs would leak across a row through the 0-weighted products.
    rows = jax.lax.broadcasted_iota(jnp.int32, (w, w2), 0)
    cols = jax.lax.broadcasted_iota(jnp.int32, (w, w2), 1)
    sel_even = (rows == 2 * cols).astype(jnp.float32)        # picks lane 2j
    sel_odd = (rows == 2 * cols + 1).astype(jnp.float32)     # picks lane 2j+1

    flat = hmax.astype(jnp.float32).reshape(cb * th2, w)
    left = jnp.dot(flat, sel_even, preferred_element_type=jnp.float32,
                   precision=jax.lax.Precision.HIGHEST)
    right = jnp.dot(flat, sel_odd, preferred_element_type=jnp.float32,
                    precision=jax.lax.Precision.HIGHEST)
    out = jnp.maximum(left, right).reshape(cb, th2, w2)
    o_ref[...] = out.astype(o_ref.dtype)


def _choose_tiles(num_images, H, W, dtype, block_bytes):
    """Pick (cb, th): images-per-block and H-rows-per-block.

    Constraints:
      * th divides H, th is even, and th % 16 == 0 unless th == H, so both the
        input tile (th rows) and output tile (th//2 rows) satisfy the TPU
        (8, 128) tiling rule (or cover the full dimension).
      * cb > 1 only when th//2 is a multiple of 8 so the in-kernel
        (cb, th//2, W) -> (cb*th//2, W) collapse is sublane-tile aligned.
      * cb * th * W * itemsize <= block_bytes, which keeps the double-buffered
        input+output comfortably inside the default scoped VMEM on every
        generation (v7x included).
    """
    itemsize = jnp.dtype(dtype).itemsize
    row_bytes = W * itemsize

    th_candidates = [t for t in range(H, 1, -1)
                     if H % t == 0 and t % 2 == 0 and (t % 16 == 0 or t == H)]
    th = th_candidates[-1]                      # smallest legal tile (fallback)
    for t in th_candidates:                     # descending: biggest that fits
        if t * row_bytes <= block_bytes:
            th = t
            break

    cb = 1
    if (th // 2) % 8 == 0:
        max_cb = max(1, block_bytes // (th * row_bytes))
        for c in range(min(num_images, max_cb), 0, -1):
            if num_images % c == 0:
                cb = c
                break
    return cb, th


def downsampling(x_nchw, *, block_bytes=4 * 1024 * 1024):
    """MaxPool2d(kernel_size=2, stride=2) on an NCHW input (PyTorch semantics)."""
    N, C, H, W = x_nchw.shape
    assert H % 2 == 0 and W % 2 == 0, "even spatial dims expected (matches pool semantics)"
    H2, W2 = H // 2, W // 2
    NC = N * C

    # Metadata-only reshape (no data movement): fold N and C into one axis.
    x = x_nchw.reshape(NC, H, W)

    cb, th = _choose_tiles(NC, H, W, x_nchw.dtype, block_bytes)
    grid = (NC // cb, H // th)

    out = pl.pallas_call(
        _maxpool2x2_kernel,
        out_shape=jax.ShapeDtypeStruct((NC, H2, W2), x_nchw.dtype),
        grid=grid,
        in_specs=[pl.BlockSpec((cb, th, W), lambda i, j: (i, j, 0))],
        out_specs=pl.BlockSpec((cb, th // 2, W2), lambda i, j: (i, j, 0)),
        compiler_params=pltpu.CompilerParams(
            dimension_semantics=("parallel", "parallel")),
    )(x)

    return out.reshape(N, C, H2, W2)


def _reference_maxpool2x2(x_nchw):
    """Pure-JAX reference (same math as torch.nn.MaxPool2d(2, 2))."""
    N, C, H, W = x_nchw.shape
    xr = x_nchw.reshape(N, C, H // 2, 2, W // 2, 2)
    return jnp.max(xr, axis=(3, 5))


if __name__ == "__main__":
    key = jax.random.PRNGKey(0)
    k1, k2 = jax.random.split(key)

    # Small NCHW shape implied by the module's forward.
    x = jax.random.normal(k1, (2, 4, 16, 16), dtype=jnp.float32)
    out = jax.block_until_ready(downsampling(x))
    ref = _reference_maxpool2x2(x)
    assert out.shape == (2, 4, 8, 8), out.shape
    assert out.dtype == x.dtype
    assert jnp.allclose(out, ref), "Pallas maxpool mismatch vs reference"

    # Also exercise the multi-block (tiled, grid > 1) path by shrinking the
    # per-block byte budget.
    x2 = jax.random.normal(k2, (2, 4, 32, 32), dtype=jnp.float32)
    out2 = jax.block_until_ready(downsampling(x2, block_bytes=2048))
    assert jnp.allclose(out2, _reference_maxpool2x2(x2)), "tiled-path mismatch"

    print("KERNEL_OK")
</pallas_src>

<mosaic_0001>
module attributes {stable_mosaic.version = 11 : i64} {
  func.func @_maxpool2x2_kernel(%arg0: i32, %arg1: i32, %arg2: memref<8x16x16xf32, #tpu.memory_space<vmem>>, %arg3: memref<8x8x8xf32, #tpu.memory_space<vmem>>) attributes {dimension_semantics = [#tpu.dimension_semantics<parallel>, #tpu.dimension_semantics<parallel>], iteration_bounds = array<i64: 1, 1>, scalar_prefetch = 0 : i64, scratch_operands = 0 : i64, tpu.core_type = #tpu.core_type<tc>, window_params = [{transform_indices = @transform_0, window_bounds = array<i64: 8, 16, 16>}, {transform_indices = @transform_1, window_bounds = array<i64: 8, 8, 8>}]} {
    %c0 = arith.constant 0 : index
    %c0_0 = arith.constant 0 : index
    %c0_1 = arith.constant 0 : index
    %0 = tpu.strided_load %arg2[%c0, %c0_0, %c0_1] {strides = array<i32: 1, 2, 1>} : memref<8x16x16xf32, #tpu.memory_space<vmem>>, vector<8x8x16xf32>
    %c0_2 = arith.constant 0 : index
    %c1 = arith.constant 1 : index
    %c0_3 = arith.constant 0 : index
    %1 = tpu.strided_load %arg2[%c0_2, %c1, %c0_3] {strides = array<i32: 1, 2, 1>} : memref<8x16x16xf32, #tpu.memory_space<vmem>>, vector<8x8x16xf32>
    %2 = arith.maximumf %0, %1 : vector<8x8x16xf32>
    %3 = tpu.iota {dimensions = array<i32: 0>} : vector<16x8xi32>
    %4 = tpu.iota {dimensions = array<i32: 1>} : vector<16x8xi32>
    %c2_i32 = arith.constant 2 : i32
    %5 = vector.broadcast %c2_i32 : i32 to vector<16x8xi32>
    %6 = arith.muli %5, %4 : vector<16x8xi32>
    %7 = arith.cmpi eq, %3, %6 : vector<16x8xi32>
    %8 = arith.extui %7 : vector<16x8xi1> to vector<16x8xi32>
    %9 = arith.sitofp %8 : vector<16x8xi32> to vector<16x8xf32>
    %c2_i32_4 = arith.constant 2 : i32
    %10 = vector.broadcast %c2_i32_4 : i32 to vector<16x8xi32>
    %11 = arith.muli %10, %4 : vector<16x8xi32>
    %c1_i32 = arith.constant 1 : i32
    %12 = vector.broadcast %c1_i32 : i32 to vector<16x8xi32>
    %13 = arith.addi %11, %12 : vector<16x8xi32>
    %14 = arith.cmpi eq, %3, %13 : vector<16x8xi32>
    %15 = arith.extui %14 : vector<16x8xi1> to vector<16x8xi32>
    %16 = arith.sitofp %15 : vector<16x8xi32> to vector<16x8xf32>
    %17 = vector.shape_cast %2 : vector<8x8x16xf32> to vector<64x16xf32>
    %cst = arith.constant dense<0.000000e+00> : vector<64x8xf32>
    %18 = tpu.matmul %17, %9, %cst {dimension_numbers = #tpu.dot_dimension_numbers<[1], [0], [0], [1], [0, 0, 1, 1], [], []>, precision = #tpu.contract_precision<fp32>} : vector<64x16xf32>, vector<16x8xf32>, vector<64x8xf32> -> vector<64x8xf32>
    %cst_5 = arith.constant dense<0.000000e+00> : vector<64x8xf32>
    %19 = tpu.matmul %17, %16, %cst_5 {dimension_numbers = #tpu.dot_dimension_numbers<[1], [0], [0], [1], [0, 0, 1, 1], [], []>, precision = #tpu.contract_precision<fp32>} : vector<64x16xf32>, vector<16x8xf32>, vector<64x8xf32> -> vector<64x8xf32>
    %20 = arith.maximumf %18, %19 : vector<64x8xf32>
    %21 = vector.shape_cast %20 : vector<64x8xf32> to vector<8x8x8xf32>
    %c0_6 = arith.constant 0 : index
    %c0_7 = arith.constant 0 : index
    %c0_8 = arith.constant 0 : index
    %22 = vector.load %arg3[%c0_6, %c0_7, %c0_8] : memref<8x8x8xf32, #tpu.memory_space<vmem>>, vector<8x8x8xf32>
    tpu.vector_store %arg3[%c0_6, %c0_7, %c0_8], %21 {strides = array<i32>} : memref<8x8x8xf32, #tpu.memory_space<vmem>>, vector<8x8x8xf32>,
    return
  }
  func.func @transform_0(%arg0: i32, %arg1: i32) -> (i32, i32, i32) {
    %c0_i32 = arith.constant 0 : i32
    %c0_i32_0 = arith.constant 0 : i32
    return %arg0, %arg1, %c0_i32 : i32, i32, i32
  }
  func.func @transform_1(%arg0: i32, %arg1: i32) -> (i32, i32, i32) {
    %c0_i32 = arith.constant 0 : i32
    %c0_i32_0 = arith.constant 0 : i32
    return %arg0, %arg1, %c0_i32 : i32, i32, i32
  }
}

</mosaic_0001>

<bundles_post_ra>
// kernel: tpu_custom_call.1
= control target key start
LH: loop header
LB: loop body
LE: loop exit
PB: predicated region body
PF: predicated region fallthrough
CT: control target
= control target key end

     0   :  { %6 = vsyncpa [#allocation3], 0  ;;  %s2545_s0 = inlined_call_operand.hbm [shape: f32[8,16,16], index: 0, kind: input, shape index: {}]   ;;  %s2546_s1 = inlined_call_operand.hbm [shape: f32[8,8,8], index: 1, kind: output, shape index: {}]  }
   0x1   :  { %7 = vsyncpa [#allocation4], 0  ;;  %s2038_s6 = smov [#allocation2]  }
   0x2   :  { %s13_s7 = sshll.u32 %s2038_s6, 4  ;;  %s14_s7 = int_to_ptr.vmem [resolvable:$true] %s13_s7 }
   0x3   :  { %s2002_s8 = scalar_lea.vmem %s14_s7, 2048  ;;  %p2007_p1 = scmp.lt.s32.totalorder %s14_s7, %s14_s7 }
   0x4   :  { %p2003_p0 = scmp.ne.s32.totalorder %s14_s7, %s2002_s8  ;;  %p2008_p2 = scmp.lt.s32.totalorder %s2002_s8, %s2002_s8 }
   0x6   :  { %p2009_p3 = por %p2008_p2, %p2007_p1 }
   0x8   :  { %p2010_p4 = pnand %p2009_p3, %p2003_p0 }
   0xa   :  { %2013 = shalt.err (!%p2010_p4)
}
   0xb   :  { %s2039_s9 = smov 128   ;;  %s2040_s10 = smov 8  }
   0xc   :  { %19 = dma.hbm_to_vmem [thread:$0]  %s2545_s0, 2048, %s14_s7, [#allocation3], %s2039_s9, %s2039_s9, %s2040_s10  }
   0xd   :  { %2034 = dma.done.wait [#allocation3], 2048  }
   0xe   :  { %2035 = vsyncadd [#allocation3], 4294965248  ;;  %v62_v0 = vlaneseq  ;;  %vm81_vm2 = vcmask 130048   ;;  %v2041_v8 = vmov 1.0   ;;  %v2042_v9 = vmov 0.0   ;;  %s2043_s0 = smov [#allocation5]  }
   0xf   :  { %v23_v12 = vld [vmem:[#allocation2] ss:$2 sm:$0xff]  ;;  %v39_v13 = vld [vmem:[#allocation2 + $0x1] ss:$2 sm:$0xff]  ;;  %v25_v17 = vld [vmem:[#allocation2 + $0x10] ss:$2 sm:$0xff] }
  0x10   :  { %v2060_v1 = vshrl.u32 %v62_v0, 7  ;;  %v66_v2 = vand.u32 127, %v62_v0  ;;  %v54_v16 = vmax.f32 %v23_v12, %v39_v13  ;;  %v41_v18 = vld [vmem:[#allocation2 + $0x11] ss:$2 sm:$0xff]  ;;  %v27_v19 = vld [vmem:[#allocation2 + $0x20] ss:$2 sm:$0xff] }
  0x11   :  { %v55_v20 = vmax.f32 %v25_v17, %v41_v18  ;;  %v43_v21 = vld [vmem:[#allocation2 + $0x21] ss:$2 sm:$0xff]  ;;  %v29_v22 = vld [vmem:[#allocation2 + $0x30] ss:$2 sm:$0xff]  ;;  %v45_v23 = vld [vmem:[#allocation2 + $0x31] ss:$2 sm:$0xff] }
  0x12   :  { %v2063_v3 = vadd.s32 8, %v2060_v1  ;;  %v67_v4 = vmul.u32 2, %v66_v2  ;;  %v83_v26 = vsel %vm81_vm2, %v54_v16, 0  ;;  %v56_v27 = vmax.f32 %v27_v19, %v43_v21  ;;  %v31_v28 = vld [vmem:[#allocation2 + $0x40] ss:$2 sm:$0xff]  ;;  %s1648_s13 = sshll.u32 %s2043_s0, 4  ;;  %s1649_s13 = int_to_ptr.vmem [resolvable:$true] %s1648_s13 }
  0x13   :  { %v2106_v29 = vand.u32 4294901760, %v83_v26  ;;  %v86_v30 = vsel %vm81_vm2, %v55_v20, 0  ;;  %v57_v31 = vmax.f32 %v29_v22, %v45_v23  ;;  %v47_v32 = vld [vmem:[#allocation2 + $0x41] ss:$2 sm:$0xff]  ;;  %v33_v33 = vld [vmem:[#allocation2 + $0x50] ss:$2 sm:$0xff]  ;;  %p2019_p6 = scmp.lt.s32.totalorder %s1649_s13, %s1649_s13 }
  0x14   :  { %vm2066_vm0 = vcmp.eq.s32.totalorder %v2063_v3, %v67_v4  ;;  %vm2071_vm1 = vcmp.eq.s32.totalorder %v2060_v1, %v67_v4  ;;  %v2075_v7 = vadd.s32 1, %v67_v4  ;;  %v2114_v36 = vand.u32 4294901760, %v86_v30  ;;  %v49_v38 = vld [vmem:[#allocation2 + $0x51] ss:$2 sm:$0xff]  ;;  %v35_v39 = vld [vmem:[#allocation2 + $0x60] ss:$2 sm:$0xff] }
  0x15   :  { %1796 = vmatprep.subr.msk.mxu0 %vm2066_vm0, %v2041_v8  ;;  %v1661_v10 = vsel %vm2066_vm0, 1.0, %v2042_v9  ;;  %v1660_v11 = vsel %vm2071_vm1, 1.0, %v2042_v9  ;;  %v89_v37 = vsel %vm81_vm2, %v56_v27, 0  ;;  %v2118_v40 = vsub.f32 %v83_v26, %v2106_v29  ;;  %1816 = vmatprep.mubr.f32.mxu1 %v2106_v29  ;;  %v51_v44 = vld [vmem:[#allocation2 + $0x61] ss:$2 sm:$0xff]  ;;  %s2014_s14 = scalar_lea.vmem %s1649_s13, 1024 }
  0x16   :  { %1797 = vmatpush3.msk.msra.mxu0 %vm2066_vm0, %v2041_v8  ;;  %v2089_v14 = vsub.f32 %v1661_v10, %v1661_v10  ;;  %v2091_v15 = vsub.f32 %v1660_v11, %v1660_v11  ;;  %v2121_v41 = vand.u32 4294901760, %v89_v37  ;;  %v92_v42 = vsel %vm81_vm2, %v57_v31, 0  ;;  %v37_v45 = vld [vmem:[#allocation2 + $0x70] ss:$2 sm:$0xff]  ;;  %v53_v50 = vld [vmem:[#allocation2 + $0x71] ss:$2 sm:$0xff]  ;;  %p2015_p5 = scmp.ne.s32.totalorder %s1649_s13, %s2014_s14  ;;  %p2020_p7 = scmp.lt.s32.totalorder %s2014_s14, %s2014_s14 }
  0x17   :  { %1798 = vmatprep.subr.msk.mxu0 %vm2071_vm1, %v2041_v8  ;;  %v58_v43 = vmax.f32 %v31_v28, %v47_v32  ;;  %v2125_v48 = vsub.f32 %v86_v30, %v2114_v36  ;;  %v2127_v49 = vand.u32 4294901760, %v92_v42  ;;  %v2130_v51 = vand.u32 4294901760, %v2118_v40 }
  0x18   :  { %v2097_v24 = vand.u32 4294901760, %v2089_v14  ;;  %1799 = vmatpush3.msk.msra.mxu0 %vm2071_vm1, %v2041_v8  ;;  %v2103_v25 = vand.u32 4294901760, %v2091_v15  ;;  %v2133_v52 = vsub.f32 %v89_v37, %v2121_v41  ;;  %v59_v54 = vmax.f32 %v33_v33, %v49_v38  ;;  %p2021_p8 = por %p2020_p7, %p2019_p6 }
  0x19   :  { %1828 = vmatprep.subr.mxu0 %v2089_v14  ;;  %v95_v53 = vsel %vm81_vm2, %v58_v43, 0  ;;  %v2137_v55 = vand.u32 4294901760, %v2125_v48  ;;  %v2140_v56 = vsub.f32 %v92_v42, %v2127_v49  ;;  %v60_v58 = vmax.f32 %v35_v39, %v51_v44 }
  0x1a   :  { %v285_v34 = vsub.f32 %v2089_v14, %v2097_v24  ;;  %v292_v35 = vsub.f32 %v2091_v15, %v2103_v25  ;;  %v2142_v57 = vand.u32 4294901760, %v95_v53  ;;  %v176_v59 = vsub.f32 %v2118_v40, %v2130_v51  ;;  %p2022_p9 = pnand %p2021_p8, %p2015_p5 }
  0x1b   :  { %v2147_v60 = vand.u32 4294901760, %v2133_v52  ;;  %v98_v61 = vsel %vm81_vm2, %v59_v54, 0  ;;  %v61_v62 = vmax.f32 %v37_v45, %v53_v50  ;;  %v186_v63 = vsub.f32 %v2125_v48, %v2137_v55 }
  0x1c   :  { %v286_v46 = vand.u32 4294901760, %v285_v34  ;;  %v293_v47 = vand.u32 4294901760, %v292_v35  ;;  %v2153_v0 = vand.u32 4294901760, %v2140_v56  ;;  %v2156_v2 = vsub.f32 %v95_v53, %v2142_v57 }
  0x1d   :  { %v2158_v4 = vand.u32 4294901760, %v98_v61  ;;  %v2160_v10 = vand.u32 4294901760, %v176_v59  ;;  %v196_v11 = vsub.f32 %v2133_v52, %v2147_v60  ;;  %v101_v12 = vsel %vm81_vm2, %v60_v58, 0 }
  0x1e   :  { %1812 = vmatprep.subr.mxu1 %v286_v46  ;;  %v104_v13 = vsel %vm81_vm2, %v61_v62, 0  ;;  %v2166_v16 = vand.u32 4294901760, %v186_v63  ;;  %v206_v17 = vsub.f32 %v2140_v56, %v2153_v0  ;;  %v2175_v18 = vand.u32 4294901760, %v2156_v2 }
  0x1f   :  { %1813 = vmatpush3.msra.mxu1 %v286_v46  ;;  %v2178_v19 = vsub.f32 %v98_v61, %v2158_v4  ;;  %1800 = vmatprep.mubr.f32.mxu0 %v2160_v10  ;;  %v2184_v20 = vand.u32 4294901760, %v196_v11  ;;  %v2186_v21 = vand.u32 4294901760, %v101_v12  ;;  %v2188_v22 = vand.u32 4294901760, %v104_v13 }
  0x20   :  { %1814 = vmatprep.subr.mxu1 %v293_v47  ;;  %1801 = vmatmul.mubr.f32.vlgmr.msra.gmra.mxu0 %v2166_v16  ;;  %v2192_v23 = vand.u32 4294901760, %v206_v17  ;;  %v216_v26 = vsub.f32 %v2156_v2, %v2175_v18  ;;  %vm2201_vm3 = vcmp.eq.s32.totalorder %v2063_v3, %v2075_v7  ;;  %vm2264_vm4 = vcmp.eq.s32.totalorder %v2060_v1, %v2075_v7 }
  0x21   :  { %1815 = vmatpush3.msra.mxu1 %v293_v47  ;;  %v2197_v27 = vand.u32 4294901760, %v2178_v19  ;;  %1829 = vmatpush3.msra.mxu0 %v2089_v14  ;;  %v2208_v30 = vsub.f32 %v101_v12, %v2186_v21  ;;  %v2211_v31 = vsub.f32 %v104_v13, %v2188_v22  ;;  %v1663_v34 = vsel %vm2201_vm3, 1.0, %v2042_v9 }
  0x22   :  { %1817 = vmatmul.mubr.f32.vlgmr.msra.gmra.mxu1 %v2114_v36  ;;  %1844 = vmatprep.subr.msk.mxu1 %vm2066_vm0, %v2041_v8  ;;  %v2214_v32 = vand.u32 4294901760, %v216_v26  ;;  %v2246_v38 = vsub.f32 %v1663_v34, %v1663_v34  ;;  %v1662_v45 = vsel %vm2264_vm4, 1.0, %v2042_v9  ;;  %vm1634_vm5 = vcmask 64512  }
  0x23   :  { %1845 = vmatpush3.msk.msra.mxu1 %vm2066_vm0, %v2041_v8  ;;  %1819 = vmatprep.mubr.f32.mxu1 %v2121_v41  ;;  %v226_v3 = vsub.f32 %v2178_v19, %v2197_v27  ;;  %v2222_v14 = vand.u32 4294901760, %v2208_v30  ;;  %v2225_v33 = vand.u32 4294901760, %v2211_v31  ;;  %v1050_v1 = vsub.f32 %v1662_v45, %v1662_v45 }
  0x24   :  { %1803 = vmatprep.mubr.f32.mxu0 %v2184_v20  ;;  %1830 = vmatprep.subr.mxu0 %v2091_v15  ;;  %v2260_v43 = vand.u32 4294901760, %v2246_v38 }
  0x25   :  { %1831 = vmatpush3.msra.mxu0 %v2091_v15  ;;  %v2231_v35 = vand.u32 4294901760, %v226_v3  ;;  %1846 = vmatprep.subr.msk.mxu1 %vm2071_vm1, %v2041_v8  ;;  %v236_v15 = vsub.f32 %v2208_v30, %v2222_v14  ;;  %v246_v37 = vsub.f32 %v2211_v31, %v2225_v33  ;;  %v2295_v5 = vand.u32 4294901760, %v1050_v1 }
  0x26   :  { %1820 = vmatmul.mubr.f32.gmra.mxu1 %v2127_v49  ;;  %1804 = vmatmul.mubr.f32.gmra.mxu0 %v2192_v23  ;;  %v1045_v46 = vsub.f32 %v2246_v38, %v2260_v43 }
  0x27   :  { %1822 = vmatprep.mubr.f32.mxu1 %v2142_v57  ;;  %1806 = vmatprep.mubr.f32.mxu0 %v2214_v32  ;;  %v2248_v39 = vand.u32 4294901760, %v236_v15  ;;  %v2255_v42 = vand.u32 4294901760, %v246_v37  ;;  %v1052_v9 = vsub.f32 %v1050_v1, %v2295_v5 }
  0x28   :  { %1847 = vmatpush3.msk.msra.mxu1 %vm2071_vm1, %v2041_v8  ;;  %1860 = vmatprep.subr.mxu0 %v2097_v24  ;;  %v1046_v7 = vand.u32 4294901760, %v1045_v46 }
  0x29   :  { %1876 = vmatprep.subr.msk.mxu1 %vm2066_vm0, %v2041_v8  ;;  %v1053_v6 = vand.u32 4294901760, %v1052_v9 }
  0x2a   :  { %1823 = vmatmul.mubr.f32.gmra.mxu1 %v2158_v4  ;;  %1807 = vmatmul.mubr.f32.gmra.mxu0 %v2231_v35 }
  0x2b   :  { %1825 = vmatprep.mubr.f32.mxu1 %v2186_v21  ;;  %1809 = vmatprep.mubr.f32.mxu0 %v2248_v39 }
  0x2e   :  { %1826 = vmatmul.mubr.f32.gmra.mxu1 %v2188_v22  ;;  %1810 = vmatmul.mubr.f32.gmra.mxu0 %v2255_v42 }
  0x2f   :  { %1848 = vmatprep.mubr.f32.mxu1 %v2130_v51  ;;  %1832 = vmatprep.mubr.f32.mxu0 %v2118_v40 }
  0x32   :  { %1849 = vmatmul.mubr.f32.vlgmr.msra.gmra.mxu1 %v2137_v55  ;;  %1833 = vmatmul.mubr.f32.vlgmr.msra.gmra.mxu0 %v2125_v48 }
  0x33   :  { %1877 = vmatpush3.msk.msra.mxu1 %vm2066_vm0, %v2041_v8  ;;  %1851 = vmatprep.mubr.f32.mxu1 %v2147_v60 }
  0x34   :  { %1878 = vmatprep.subr.msk.mxu1 %vm2071_vm1, %v2041_v8  ;;  %1861 = vmatpush3.msra.mxu0 %v2097_v24 }
  0x35   :  { %1835 = vmatprep.mubr.f32.mxu0 %v2133_v52  ;;  %1862 = vmatprep.subr.mxu0 %v2103_v25 }
  0x36   :  { %1852 = vmatmul.mubr.f32.gmra.mxu1 %v2153_v0  ;;  %1863 = vmatpush3.msra.mxu0 %v2103_v25 }
  0x37   :  { %1854 = vmatprep.mubr.f32.mxu1 %v2175_v18  ;;  %1836 = vmatmul.mubr.f32.gmra.mxu0 %v2140_v56 }
  0x38   :  { %1879 = vmatpush3.msk.msra.mxu1 %vm2071_vm1, %v2041_v8  ;;  %1838 = vmatprep.mubr.f32.mxu0 %v2156_v2 }
  0x39   :  { %1892 = vmatprep.subr.msk.mxu0 %vm2201_vm3, %v2041_v8  ;;  %1908 = vmatprep.subr.mxu1 %v1046_v7 }
  0x3a   :  { %1855 = vmatmul.mubr.f32.gmra.mxu1 %v2197_v27 }
  0x3b   :  { %1857 = vmatprep.mubr.f32.mxu1 %v2222_v14  ;;  %1839 = vmatmul.mubr.f32.gmra.mxu0 %v2178_v19 }
  0x3c   :  { %1841 = vmatprep.mubr.f32.mxu0 %v2208_v30 }
  0x3e   :  { %1858 = vmatmul.mubr.f32.gmra.mxu1 %v2225_v33 }
  0x3f   :  { %1880 = vmatprep.mubr.f32.mxu1 %v2106_v29  ;;  %1842 = vmatmul.mubr.f32.gmra.mxu0 %v2211_v31 }
  0x40   :  { %1864 = vmatprep.mubr.f32.mxu0 %v2106_v29 }
  0x42   :  { %1881 = vmatmul.mubr.f32.vlgmr.msra.gmra.mxu1 %v2114_v36 }
  0x43   :  { %1909 = vmatpush3.msra.mxu1 %v1046_v7  ;;  %1883 = vmatprep.mubr.f32.mxu1 %v2121_v41 }
  0x44   :  { %1865 = vmatmul.mubr.f32.vlgmr.msra.gmra.mxu0 %v2114_v36  ;;  %1910 = vmatprep.subr.mxu1 %v1053_v6 }
  0x45   :  { %1893 = vmatpush3.msk.msra.mxu0 %vm2201_vm3, %v2041_v8  ;;  %1867 = vmatprep.mubr.f32.mxu0 %v2121_v41 }
  0x46   :  { %1884 = vmatmul.mubr.f32.gmra.mxu1 %v2127_v49  ;;  %1894 = vmatprep.subr.msk.mxu0 %vm2264_vm4, %v2041_v8 }
  0x47   :  { %1886 = vmatprep.mubr.f32.mxu1 %v2142_v57  ;;  %1895 = vmatpush3.msk.msra.mxu0 %vm2264_vm4, %v2041_v8 }
  0x48   :  { %1868 = vmatmul.mubr.f32.gmra.mxu0 %v2127_v49  ;;  %1911 = vmatpush3.msra.mxu1 %v1053_v6 }
  0x49   :  { %1870 = vmatprep.mubr.f32.mxu0 %v2142_v57  ;;  %1924 = vmatprep.subr.mxu0 %v2246_v38 }
  0x4a   :  { %1887 = vmatmul.mubr.f32.gmra.mxu1 %v2158_v4  ;;  %1940 = vmatprep.subr.msk.mxu1 %vm2201_vm3, %v2041_v8 }
  0x4b   :  { %1889 = vmatprep.mubr.f32.mxu1 %v2186_v21 }
  0x4c   :  { %1871 = vmatmul.mubr.f32.gmra.mxu0 %v2158_v4 }
  0x4d   :  { %1873 = vmatprep.mubr.f32.mxu0 %v2186_v21 }
  0x4e   :  { %1890 = vmatmul.mubr.f32.gmra.mxu1 %v2188_v22 }
  0x4f   :  { %1912 = vmatprep.mubr.f32.mxu1 %v2106_v29 }
  0x50   :  { %1874 = vmatmul.mubr.f32.gmra.mxu0 %v2188_v22 }
  0x51   :  { %1896 = vmatprep.mubr.f32.mxu0 %v2160_v10 }
  0x52   :  { %1913 = vmatmul.mubr.f32.vlgmr.msra.gmra.mxu1 %v2114_v36 }
  0x53   :  { %1941 = vmatpush3.msk.msra.mxu1 %vm2201_vm3, %v2041_v8  ;;  %1915 = vmatprep.mubr.f32.mxu1 %v2121_v41 }
  0x54   :  { %1897 = vmatmul.mubr.f32.vlgmr.msra.gmra.mxu0 %v2166_v16  ;;  %1942 = vmatprep.subr.msk.mxu1 %vm2264_vm4, %v2041_v8 }
  0x55   :  { %1925 = vmatpush3.msra.mxu0 %v2246_v38  ;;  %1899 = vmatprep.mubr.f32.mxu0 %v2184_v20 }
  0x56   :  { %1916 = vmatmul.mubr.f32.gmra.mxu1 %v2127_v49  ;;  %1926 = vmatprep.subr.mxu0 %v1050_v1 }
  0x57   :  { %1918 = vmatprep.mubr.f32.mxu1 %v2142_v57  ;;  %1927 = vmatpush3.msra.mxu0 %v1050_v1 }
  0x58   :  { %1900 = vmatmul.mubr.f32.gmra.mxu0 %v2192_v23  ;;  %1943 = vmatpush3.msk.msra.mxu1 %vm2264_vm4, %v2041_v8 }
  0x59   :  { %1902 = vmatprep.mubr.f32.mxu0 %v2214_v32  ;;  %1956 = vmatprep.subr.mxu0 %v2260_v43 }
  0x5a   :  { %1919 = vmatmul.mubr.f32.gmra.mxu1 %v2158_v4  ;;  %1972 = vmatprep.subr.msk.mxu1 %vm2201_vm3, %v2041_v8 }
  0x5b   :  { %1921 = vmatprep.mubr.f32.mxu1 %v2186_v21 }
  0x5c   :  { %1903 = vmatmul.mubr.f32.gmra.mxu0 %v2231_v35 }
  0x5d   :  { %1905 = vmatprep.mubr.f32.mxu0 %v2248_v39 }
  0x5e   :  { %1922 = vmatmul.mubr.f32.gmra.mxu1 %v2188_v22 }
  0x5f   :  { %1944 = vmatprep.mubr.f32.mxu1 %v2130_v51 }
  0x60   :  { %1906 = vmatmul.mubr.f32.gmra.mxu0 %v2255_v42 }
  0x61   :  { %1928 = vmatprep.mubr.f32.mxu0 %v2118_v40 }
  0x62   :  { %1945 = vmatmul.mubr.f32.vlgmr.msra.gmra.mxu1 %v2137_v55 }
  0x63   :  { %1973 = vmatpush3.msk.msra.mxu1 %vm2201_vm3, %v2041_v8  ;;  %1947 = vmatprep.mubr.f32.mxu1 %v2147_v60 }
  0x64   :  { %1929 = vmatmul.mubr.f32.vlgmr.msra.gmra.mxu0 %v2125_v48  ;;  %1974 = vmatprep.subr.msk.mxu1 %vm2264_vm4, %v2041_v8 }
  0x65   :  { %1957 = vmatpush3.msra.mxu0 %v2260_v43  ;;  %1931 = vmatprep.mubr.f32.mxu0 %v2133_v52 }
  0x66   :  { %1948 = vmatmul.mubr.f32.gmra.mxu1 %v2153_v0  ;;  %1958 = vmatprep.subr.mxu0 %v2295_v5 }
  0x67   :  { %1950 = vmatprep.mubr.f32.mxu1 %v2175_v18  ;;  %1959 = vmatpush3.msra.mxu0 %v2295_v5 }
  0x68   :  { %1932 = vmatmul.mubr.f32.gmra.mxu0 %v2140_v56  ;;  %1975 = vmatpush3.msk.msra.mxu1 %vm2264_vm4, %v2041_v8 }
  0x69   :  { %1934 = vmatprep.mubr.f32.mxu0 %v2156_v2 }
  0x6a   :  { %1951 = vmatmul.mubr.f32.gmra.mxu1 %v2197_v27 }
  0x6b   :  { %1953 = vmatprep.mubr.f32.mxu1 %v2222_v14 }
  0x6c   :  { %1935 = vmatmul.mubr.f32.gmra.mxu0 %v2178_v19 }
  0x6d   :  { %1937 = vmatprep.mubr.f32.mxu0 %v2208_v30 }
  0x6e   :  { %1954 = vmatmul.mubr.f32.gmra.mxu1 %v2225_v33 }
  0x6f   :  { %1976 = vmatprep.mubr.f32.mxu1 %v2106_v29 }
  0x70   :  { %1938 = vmatmul.mubr.f32.gmra.mxu0 %v2211_v31 }
  0x71   :  { %1960 = vmatprep.mubr.f32.mxu0 %v2106_v29 }
  0x72   :  { %1977 = vmatmul.mubr.f32.vlgmr.msra.gmra.mxu1 %v2114_v36 }
  0x73   :  { %1979 = vmatprep.mubr.f32.mxu1 %v2121_v41 }
  0x74   :  { %1961 = vmatmul.mubr.f32.vlgmr.msra.gmra.mxu0 %v2114_v36 }
  0x75   :  { %1963 = vmatprep.mubr.f32.mxu0 %v2121_v41 }
  0x76   :  { %1980 = vmatmul.mubr.f32.gmra.mxu1 %v2127_v49 }
  0x77   :  { %1982 = vmatprep.mubr.f32.mxu1 %v2142_v57 }
  0x78   :  { %1964 = vmatmul.mubr.f32.gmra.mxu0 %v2127_v49 }
  0x79   :  { %1966 = vmatprep.mubr.f32.mxu0 %v2142_v57 }
  0x7a   :  { %1983 = vmatmul.mubr.f32.gmra.mxu1 %v2158_v4 }
  0x7b   :  { %1985 = vmatprep.mubr.f32.mxu1 %v2186_v21 }
  0x7c   :  { %1967 = vmatmul.mubr.f32.gmra.mxu0 %v2158_v4 }
  0x7d   :  { %1969 = vmatprep.mubr.f32.mxu0 %v2186_v21 }
  0x7e   :  { %1986 = vmatmul.mubr.f32.gmra.mxu1 %v2188_v22 }
  0x80   :  { %1970 = vmatmul.mubr.f32.gmra.mxu0 %v2188_v22 }
  0xe0   :  { %v1802_v24 = vpop.f32.mrf.mxu0 }
  0xe2   :  { %v1818_v8 = vpop.f32.mrf.mxu1  ;;  %v179_v36 = vpop.f32.mrf.mxu0 }
  0xe3   :  { %v2411_v29 = vadd.f32 %v1818_v8, %v1802_v24 }
  0xe4   :  { %v330_v25 = vpop.f32.mrf.mxu1 }
  0xe5   :  { %v2413_v41 = vadd.f32 %v330_v25, %v179_v36 }
  0xe6   :  { %v1821_v40 = vpop.f32.mrf.mxu1  ;;  %v1805_v47 = vpop.f32.mrf.mxu0 }
  0xe7   :  { %v2415_v49 = vadd.f32 %v1821_v40, %v1805_v47 }
  0xe8   :  { %v342_v48 = vpop.f32.mrf.mxu1  ;;  %v199_v50 = vpop.f32.mrf.mxu0 }
  0xe9   :  { %v2417_v52 = vadd.f32 %v342_v48, %v199_v50 }
  0xea   :  { %v1824_v51 = vpop.f32.mrf.mxu1  ;;  %v1808_v53 = vpop.f32.mrf.mxu0 }
  0xeb   :  { %v2419_v55 = vadd.f32 %v1824_v51, %v1808_v53 }
  0xec   :  { %v354_v54 = vpop.f32.mrf.mxu1  ;;  %v219_v56 = vpop.f32.mrf.mxu0 }
  0xed   :  { %v2421_v58 = vadd.f32 %v354_v54, %v219_v56 }
  0xee   :  { %v1827_v57 = vpop.f32.mrf.mxu1  ;;  %v1811_v59 = vpop.f32.mrf.mxu0 }
  0xef   :  { %v2423_v61 = vadd.f32 %v1827_v57, %v1811_v59 }
  0xf0   :  { %v366_v60 = vpop.f32.mrf.mxu1  ;;  %v239_v62 = vpop.f32.mrf.mxu0 }
  0xf1   :  { %v2427_v0 = vadd.f32 %v366_v60, %v239_v62 }
  0xf2   :  { %v2425_v63 = vpop.f32.mrf.mxu1  ;;  %v1834_v2 = vpop.f32.mrf.mxu0 }
  0xf4   :  { %v2429_v4 = vpop.f32.mrf.mxu1  ;;  %v448_v10 = vpop.f32.mrf.mxu0 }
  0xf6   :  { %v2431_v11 = vpop.f32.mrf.mxu1 }
  0xf7   :  { %v1837_v12 = vpop.f32.mrf.mxu0 }
  0xf8   :  { %v2433_v13 = vpop.f32.mrf.mxu1 }
  0xf9   :  { %v462_v16 = vpop.f32.mrf.mxu0 }
  0xfa   :  { %v2435_v17 = vpop.f32.mrf.mxu1 }
  0xfb   :  { %v1840_v18 = vpop.f32.mrf.mxu0 }
  0xfc   :  { %v2437_v19 = vpop.f32.mrf.mxu1 }
  0xfd   :  { %v476_v20 = vpop.f32.mrf.mxu0 }
  0xfe   :  { %v2439_v21 = vpop.f32.mrf.mxu1 }
  0xff   :  { %2555 = vst [vmem:[#allocation8_spill] sm:$0xff] %v2439_v21  ;;  %v2441_v22 = vpop.f32.mrf.mxu0 }
 0x100   :  { %v2443_v23 = vpop.f32.mrf.mxu1 }
 0x101   :  { %2556 = vst [vmem:[#allocation9_spill] sm:$0xff] %v2443_v23  ;;  %v2445_v26 = vpop.f32.mrf.mxu0  ;;  %v470_v23 = vadd.f32 %v1837_v12, %v2415_v49 }
 0x102   :  { %v2447_v27 = vpop.f32.mrf.mxu1 }
 0x104   :  { %v2449_v28 = vpop.f32.mrf.mxu0  ;;  %v2451_v30 = vpop.f32.mrf.mxu1 }
 0x106   :  { %v2453_v31 = vpop.f32.mrf.mxu0  ;;  %v2455_v32 = vpop.f32.mrf.mxu1 }
 0x107   :  { %2557 = vst [vmem:[#allocation10_spill] sm:$0xff] %v2455_v32  ;;  %v477_v32 = vadd.f32 %v476_v20, %v2421_v58 }
 0x108   :  { %v2457_v3 = vpop.f32.mrf.mxu0  ;;  %v2459_v14 = vpop.f32.mrf.mxu1 }
 0x109   :  { %2558 = vst [vmem:[#allocation11_spill] sm:$0xff] %v2459_v14 }
 0x10a   :  { %v2461_v33 = vpop.f32.mrf.mxu0  ;;  %v2463_v34 = vpop.f32.mrf.mxu1 }
 0x10b   :  { %2559 = vst [vmem:[#allocation12_spill] sm:$0xff] %v2463_v34  ;;  %v449_v34 = vadd.f32 %v448_v10, %v2413_v41 }
 0x10c   :  { %v2465_v35 = vpop.f32.mrf.mxu0  ;;  %v2467_v15 = vpop.f32.mrf.mxu1 }
 0x10d   :  { %2560 = vst [vmem:[#allocation13_spill] sm:$0xff] %v2465_v35  ;;  %2561 = vst [vmem:[#allocation14_spill] sm:$0xff] %v2467_v15  ;;  %v456_v15 = vadd.f32 %v1834_v2, %v2411_v29  ;;  %v484_v35 = vadd.f32 %v1840_v18, %v2419_v55  ;;  %v573_v49 = vadd.f32 %v2429_v4, %v449_v34 }
 0x10e   :  { %v2469_v37 = vpop.f32.mrf.mxu0  ;;  %v2471_v38 = vpop.f32.mrf.mxu1 }
 0x10f   :  { %2562 = vst [vmem:[#allocation15_spill] sm:$0xff] %v2469_v37  ;;  %2563 = vst [vmem:[#allocation16_spill] sm:$0xff] %v2471_v38  ;;  %v463_v37 = vadd.f32 %v462_v16, %v2417_v52  ;;  %v581_v29 = vadd.f32 %v2425_v63, %v456_v15  ;;  %v597_v52 = vadd.f32 %v2431_v11, %v470_v23 }
 0x110   :  { %v2473_v39 = vpop.f32.mrf.mxu0  ;;  %v2475_v42 = vpop.f32.mrf.mxu1  ;;  %v605_v63 = vadd.f32 %v2437_v19, %v477_v32  ;;  %v706_v15 = vadd.f32 %v2453_v31, %v573_v49  ;;  %v498_v11 = vadd.f32 %v2441_v22, %v2423_v61 }
 0x111   :  { %2564 = vst [vmem:[#allocation17_spill] sm:$0xff] %v2473_v39  ;;  %2565 = vst [vmem:[#allocation18_spill] sm:$0xff] %v2475_v42  ;;  %v589_v10 = vadd.f32 %v2433_v13, %v463_v37  ;;  %v712_v55 = vadd.f32 %v2449_v28, %v581_v29  ;;  %v491_v28 = vadd.f32 %v2445_v26, %v2427_v0 }
 0x112   :  { %v2477_v43 = vpop.f32.mrf.mxu0  ;;  %v1914_v44 = vpop.f32.mrf.mxu1 }
 0x113   :  { %2566 = vst [vmem:[#allocation19_spill] sm:$0xff] %v2477_v43  ;;  %v827_v31 = vadd.f32 %v2447_v27, %v712_v55  ;;  %v718_v61 = vadd.f32 %v2461_v33, %v589_v10 }
 0x114   :  { %v1898_v45 = vpop.f32.mrf.mxu0  ;;  %v1090_v46 = vpop.f32.mrf.mxu1 }
 0x115   :  { %v1097_v39 = vadd.f32 %v1914_v44, %v1898_v45  ;;  %v724_v45 = vadd.f32 %v2457_v3, %v597_v52 }
 0x116   :  { %v939_v1 = vpop.f32.mrf.mxu0  ;;  %v1917_v7 = vpop.f32.mrf.mxu1 }
 0x118   :  { %v1901_v5 = vpop.f32.mrf.mxu0  ;;  %v1102_v9 = vpop.f32.mrf.mxu1 }
 0x119   :  { %v1109_v2 = vadd.f32 %v1917_v7, %v1901_v5  ;;  %v821_v5 = vadd.f32 %v2451_v30, %v706_v15 }
 0x11a   :  { %v959_v6 = vpop.f32.mrf.mxu0  ;;  %v1920_v8 = vpop.f32.mrf.mxu1 }
 0x11b   :  { %v1103_v18 = vadd.f32 %v1102_v9, %v959_v6 }
 0x11c   :  { %v1904_v24 = vpop.f32.mrf.mxu0  ;;  %v1114_v25 = vpop.f32.mrf.mxu1 }
 0x11d   :  { %v1121_v44 = vadd.f32 %v1920_v8, %v1904_v24 }
 0x11e   :  { %v979_v36 = vpop.f32.mrf.mxu0  ;;  %v2479_v40 = vpop.f32.mrf.mxu1 }
 0x11f   :  { %2567 = vst [vmem:[#allocation20_spill] sm:$0xff] %v2479_v40 }
 0x120   :  { %v1907_v47 = vpop.f32.mrf.mxu0  ;;  %v2481_v48 = vpop.f32.mrf.mxu1 }
 0x121   :  { %2568 = vst [vmem:[#allocation21_spill] sm:$0xff] %v2481_v48  ;;  %v1091_v48 = vadd.f32 %v1090_v46, %v939_v1  ;;  %v1115_v46 = vadd.f32 %v1114_v25, %v979_v36  ;;  %v2572_v25 = vld [vmem:[#allocation10_spill] sm:$0xff] }
 0x122   :  { %v2483_v50 = vpop.f32.mrf.mxu0  ;;  %v1946_v51 = vpop.f32.mrf.mxu1  ;;  %v839_v36 = vadd.f32 %v2572_v25, %v724_v45  ;;  %v2584_v45 = vld [vmem:[#allocation19_spill] sm:$0xff] }
 0x123   :  { %2569 = vst [vmem:[#allocation22_spill] sm:$0xff] %v2483_v50 }
 0x124   :  { %v1930_v53 = vpop.f32.mrf.mxu0  ;;  %v1332_v54 = vpop.f32.mrf.mxu1 }
 0x125   :  { %v1216_v50 = vadd.f32 %v1930_v53, %v1097_v39  ;;  %v613_v39 = vadd.f32 %v2435_v17, %v484_v35 }
 0x126   :  { %v1208_v56 = vpop.f32.mrf.mxu0  ;;  %v1949_v57 = vpop.f32.mrf.mxu1  ;;  %v2571_v22 = vld [vmem:[#allocation20_spill] sm:$0xff] }
 0x127   :  { %v1209_v41 = vadd.f32 %v1208_v56, %v1091_v48  ;;  %v1341_v58 = vadd.f32 %v1946_v51, %v1216_v50  ;;  %v1133_v9 = vadd.f32 %v2571_v22, %v1907_v47  ;;  %v2573_v48 = vld [vmem:[#allocation13_spill] sm:$0xff] }
 0x128   :  { %v1933_v59 = vpop.f32.mrf.mxu0  ;;  %v1348_v60 = vpop.f32.mrf.mxu1  ;;  %v736_v27 = vadd.f32 %v2573_v48, %v613_v39  ;;  %v2575_v51 = vld [vmem:[#allocation21_spill] sm:$0xff]  ;;  %v2581_v39 = vld [vmem:[#allocation12_spill] sm:$0xff] }
 0x129   :  { %v1230_v20 = vadd.f32 %v1933_v59, %v1109_v2  ;;  %v1333_v13 = vadd.f32 %v1332_v54, %v1209_v41  ;;  %v2576_v59 = vld [vmem:[#allocation8_spill] sm:$0xff]  ;;  %v2578_v2 = vld [vmem:[#allocation15_spill] sm:$0xff] }
 0x12a   :  { %v1222_v62 = vpop.f32.mrf.mxu0  ;;  %v1952_v42 = vpop.f32.mrf.mxu1  ;;  %v2574_v50 = vld [vmem:[#allocation22_spill] sm:$0xff]  ;;  %v730_v41 = vadd.f32 %v2578_v2, %v605_v63  ;;  %v851_v15 = vadd.f32 %v2581_v39, %v736_v27 }
 0x12b   :  { %v1223_v23 = vadd.f32 %v1222_v62, %v1103_v18  ;;  %v1357_v32 = vadd.f32 %v1949_v57, %v1230_v20  ;;  %v1127_v53 = vadd.f32 %v2575_v51, %v2574_v50  ;;  %v2577_v62 = vld [vmem:[#allocation11_spill] sm:$0xff] }
 0x12c   :  { %v1936_v38 = vpop.f32.mrf.mxu0  ;;  %v2485_v43 = vpop.f32.mrf.mxu1  ;;  %v833_v29 = vadd.f32 %v2577_v62, %v718_v61 }
 0x12d   :  { %2570 = vst [vmem:[#allocation23_spill] sm:$0xff] %v2485_v43  ;;  %v1244_v17 = vadd.f32 %v1936_v38, %v1121_v44  ;;  %v1349_v26 = vadd.f32 %v1348_v60, %v1223_v23  ;;  %v629_v60 = vadd.f32 %v2576_v59, %v498_v11  ;;  %v2582_v44 = vld [vmem:[#allocation17_spill] sm:$0xff] }
 0x12e   :  { %v1236_v14 = vpop.f32.mrf.mxu0  ;;  %v2491_v21 = vpop.f32.mrf.mxu1 }
 0x12f   :  { %v1237_v6 = vadd.f32 %v1236_v14, %v1115_v46  ;;  %v1373_v54 = vadd.f32 %v1952_v42, %v1244_v17 }
 0x130   :  { %v1939_v40 = vpop.f32.mrf.mxu0  ;;  %v2495_v43 = vpop.f32.mrf.mxu1 }
 0x131   :  { %v1258_v33 = vadd.f32 %v1939_v40, %v1133_v9 }
 0x132   :  { %v1250_v12 = vpop.f32.mrf.mxu0  ;;  %v1978_v16 = vpop.f32.mrf.mxu1 }
 0x133   :  { %v1251_v55 = vadd.f32 %v1250_v12, %v1127_v53  ;;  %v1389_v11 = vadd.f32 %v2491_v21, %v1258_v33  ;;  %v2583_v12 = vld [vmem:[#allocation14_spill] sm:$0xff]  ;;  %v2585_v21 = vld [vmem:[#allocation16_spill] sm:$0xff] }
 0x134   :  { %v1962_v4 = vpop.f32.mrf.mxu0  ;;  %v1580_v34 = vpop.f32.mrf.mxu1  ;;  %v2579_v49 = vld [vmem:[#allocation23_spill] sm:$0xff] }
 0x135   :  { %v1472_v37 = vadd.f32 %v1962_v4, %v1341_v58  ;;  %v1365_v52 = vadd.f32 %v2579_v49, %v1237_v6  ;;  %v2580_v58 = vld [vmem:[#allocation9_spill] sm:$0xff]  ;;  %v748_v4 = vadd.f32 %v2582_v44, %v629_v60  ;;  %v2586_v6 = vld [vmem:[#allocation18_spill] sm:$0xff] }
 0x136   :  { %v1465_v35 = vpop.f32.mrf.mxu0  ;;  %v1981_v19 = vpop.f32.mrf.mxu1  ;;  %v621_v20 = vadd.f32 %v2580_v58, %v491_v28  ;;  %v1381_v28 = vadd.f32 %v2495_v43, %v1251_v55 }
 0x137   :  { %v1587_v1 = vadd.f32 %v1978_v16, %v1472_v37  ;;  %v1466_v7 = vadd.f32 %v1465_v35, %v1333_v13  ;;  %v845_v37 = vadd.f32 %v2583_v12, %v730_v41 }
 0x138   :  { %v1965_v8 = vpop.f32.mrf.mxu0  ;;  %v1592_v0 = vpop.f32.mrf.mxu1  ;;  %v742_v46 = vadd.f32 %v2584_v45, %v621_v20 }
 0x139   :  { %v1627_v3 = vmax.f32 %v827_v31, %v1587_v1  ;;  %v1581_v24 = vadd.f32 %v1580_v34, %v1466_v7  ;;  %v1484_v38 = vadd.f32 %v1965_v8, %v1357_v32  ;;  %v863_v7 = vadd.f32 %v2585_v21, %v748_v4 }
 0x13a   :  { %v1477_v30 = vpop.f32.mrf.mxu0  ;;  %v1984_v56 = vpop.f32.mrf.mxu1  ;;  %v857_v8 = vadd.f32 %v2586_v6, %v742_v46 }
 0x13b   :  { %1636 = vst.msk [vmem:[#allocation5 + $0x8] sm:$0xff] %vm1634_vm5, %v1627_v3  ;;  %v1626_v14 = vmax.f32 %v821_v5, %v1581_v24  ;;  %v1599_v47 = vadd.f32 %v1981_v19, %v1484_v38  ;;  %v1478_v57 = vadd.f32 %v1477_v30, %v1349_v26 }
 0x13c   :  { %v1968_v10 = vpop.f32.mrf.mxu0  ;;  %v1604_v16 = vpop.f32.mrf.mxu1 }
 0x13d   :  { %1635 = vst.msk [vmem:[#allocation5] sm:$0xff] %vm1634_vm5, %v1626_v14  ;;  %v1629_v42 = vmax.f32 %v839_v36, %v1599_v47  ;;  %v1593_v40 = vadd.f32 %v1592_v0, %v1478_v57  ;;  %v1496_v18 = vadd.f32 %v1968_v10, %v1373_v54 }
 0x13e   :  { %v1489_v34 = vpop.f32.mrf.mxu0  ;;  %v1987_v35 = vpop.f32.mrf.mxu1 }
 0x13f   :  { %1638 = vst.msk [vmem:[#allocation5 + $0x18] sm:$0xff] %vm1634_vm5, %v1629_v42  ;;  %v1628_v63 = vmax.f32 %v833_v29, %v1593_v40  ;;  %v1611_v13 = vadd.f32 %v1984_v56, %v1496_v18  ;;  %v1490_v23 = vadd.f32 %v1489_v34, %v1365_v52 }
 0x140   :  { %v1971_v17 = vpop.f32.mrf.mxu0  ;;  %v1616_v9 = vpop.f32.mrf.mxu1 }
 0x141   :  { %1637 = vst.msk [vmem:[#allocation5 + $0x10] sm:$0xff] %vm1634_vm5, %v1628_v63  ;;  %v1631_v19 = vmax.f32 %v851_v15, %v1611_v13  ;;  %v1605_v31 = vadd.f32 %v1604_v16, %v1490_v23  ;;  %v1508_v32 = vadd.f32 %v1971_v17, %v1389_v11 }
 0x142   :  { %v1501_v1 = vpop.f32.mrf.mxu0 }
 0x143   :  { %1640 = vst.msk [vmem:[#allocation5 + $0x28] sm:$0xff] %vm1634_vm5, %v1631_v19  ;;  %v1630_v5 = vmax.f32 %v845_v37, %v1605_v31  ;;  %v1623_v61 = vadd.f32 %v1987_v35, %v1508_v32  ;;  %v1502_v22 = vadd.f32 %v1501_v1, %v1381_v28 }
 0x145   :  { %1639 = vst.msk [vmem:[#allocation5 + $0x20] sm:$0xff] %vm1634_vm5, %v1630_v5  ;;  %v1633_v43 = vmax.f32 %v863_v7, %v1623_v61  ;;  %v1617_v0 = vadd.f32 %v1616_v9, %v1502_v22 }
 0x147   :  { %1642 = vst.msk [vmem:[#allocation5 + $0x38] sm:$0xff] %vm1634_vm5, %v1633_v43  ;;  %v1632_v26 = vmax.f32 %v857_v8, %v1617_v0 }
 0x149   :  { %1641 = vst.msk [vmem:[#allocation5 + $0x30] sm:$0xff] %vm1634_vm5, %v1632_v26 }
 0x14a   :  { %2025 = shalt.err (!%p2022_p9)
}
 0x14b   :  { %1654 = dma.vmem_to_hbm [thread:$0]  %s1649_s13, 1024, %s2546_s1, [#allocation4], %s2039_s9, %s2039_s9, %s2040_s10  }
 0x14c   :  { %2036 = dma.done.wait [#allocation4], 1024  }
 0x14d   :  { %2037 = vsyncadd [#allocation4], 4294966272 }
 0x14e   :  { %1658 = vsyncpa [#allocation3], 1 }
 0x14f   :  { %1659 = vsyncpa [#allocation4], 1 }

</bundles_post_ra>
